<compile_context>
chip_gen: v7x
topology: tpu7x:2x2x1
jax: 0.10.0
libtpu: 0.0.40
codegen_flags: <defaults>
</compile_context>

<pallas_src>
import functools

import numpy as np
import jax
import jax.numpy as jnp
from jax.experimental import pallas as pl
from jax.experimental.pallas import tpu as pltpu


def _round_up(a, m):
    return (a + m - 1) // m * m


def _vmem_budget_bytes():
    """~85% of this generation's VMEM capacity; conservative fallback if unknown."""
    try:
        info = pltpu.get_tpu_info()
        cap = int(getattr(info, "vmem_capacity_bytes", 0) or 0)
        if cap > 0:
            return int(cap * 0.85)
    except Exception:
        pass
    return 48 * 1024 * 1024  # safe on all generations (below v7x's 64 MiB)


def _default_compute_dtype(x_dtype):
    """bf16 MXU operands on v6e/v7x (f32 accumulation kept), input dtype elsewhere."""
    try:
        kind = jax.devices()[0].device_kind.lower()
        if ("v6" in kind) or ("v7" in kind):
            return jnp.dtype(jnp.bfloat16)
    except Exception:
        pass
    return jnp.dtype(x_dtype)


def _select_tiling(Cout, Cpad, K, Wp, Hout, cdt_itemsize, out_itemsize, budget,
                   max_cout_tile=None, max_band_rows=None):
    """Pick (Cout tile, band height) so the per-step VMEM estimate fits the budget."""
    cout8 = _round_up(max(Cout, 1), 8)
    cands = [t for t in (256, 128, 64, 32, 16, 8) if t <= cout8]
    if cout8 <= 256 and cout8 not in cands:
        cands.insert(0, cout8)          # exact (multiple-of-8) fit: no Cout padding
    if not cands:
        cands = [cout8]
    if max_cout_tile is not None:
        mt = _round_up(int(max_cout_tile), 8)
        seen = set()
        cands = [t for t in (min(t, mt) for t in cands)
                 if not (t in seen or seen.add(t))]

    def est_bytes(tco, bh):
        Lb = bh * Wp
        Lpad = _round_up(Lb, 128)
        extra = -(-(K - 1 + (Lpad - Lb)) // Wp)
        Fb = (bh + K - 1 + extra) * Wp
        ib = Cpad * Fb * cdt_itemsize                              # input band slab
        wb = tco * _round_up(K * K * Cpad, 128) * cdt_itemsize     # weight block
        ob = tco * Lpad * out_itemsize                             # output block
        bb = tco * 128 * 4                                         # bias block
        pb = K * K * Cpad * Lpad * cdt_itemsize                    # patches scratch
        ab = tco * Lpad * 4                                        # f32 matmul result
        slack = 2 * 1024 * 1024
        return 2 * (ib + wb + ob + bb) + pb + ab + slack           # 2x = double buffering

    bh_cands = []
    bh = Hout if max_band_rows is None else max(1, min(Hout, int(max_band_rows)))
    while True:
        bh_cands.append(bh)
        if bh == 1:
            break
        bh = max(1, bh // 2)

    for bh in bh_cands:
        for tco in cands:
            if est_bytes(tco, bh) <= budget:
                return tco, bh
    return cands[-1], 1


def _decnn2d_kernel(xb_ref, w_ref, b_ref, o_ref, patches_ref, *, K, Wp, Lpad, Cpad):
    """One (image, row-band, out-channel-block) grid step.

    xb_ref     : (1, 1, Cpad, Fb)   flat band slab (padded rows incl. halo), NCHW order
    w_ref      : (tco, K*K*Cpad)    conv-equivalent im2col weight block
    b_ref      : (tco, 1)           bias block (f32)
    o_ref      : (1, tco, Lpad)     lane-dense output block (already NCHW-ordered)
    patches_ref: (K*K*Cpad, Lpad)   persistent im2col scratch, reused across Cout blocks
    """
    c = pl.program_id(2)

    @pl.when(c == 0)
    def _build_patches():
        # Each (kh, kw) window over the band is a contiguous lane slice of the flat slab;
        # slice-store directly into the persistent scratch (no concatenate temp).
        for kh in range(K):
            for kw in range(K):
                start = kh * Wp + kw
                row0 = (kh * K + kw) * Cpad
                patches_ref[row0:row0 + Cpad, :] = xb_ref[0, 0, :, start:start + Lpad]

    acc = jnp.dot(w_ref[...], patches_ref[...],
                  preferred_element_type=jnp.float32)              # (tco, Lpad) on the MXU
    acc = acc + b_ref[...]                                         # f32 epilogue
    o_ref[0] = acc.astype(o_ref.dtype)


def decnn2d_forward(x_nchw, wt, bias, *, stride=1, padding=1, compute_dtype="auto",
                    max_cout_tile=None, max_band_rows=None):
    """Forward of DeCNN2D_cell: stride-1 ConvTranspose2d + bias (no BN).

    x_nchw: (N, Cin, H, W)
    wt    : (Cin, Cout, K, K)   PyTorch ConvTranspose2d weight layout
    bias  : (Cout,)
    compute_dtype: "auto" -> bf16 MXU operands on v6e/v7x, input dtype otherwise;
                   None -> input dtype; or an explicit dtype.  Accumulation stays f32.
    """
    N, Cin, H, W = x_nchw.shape
    Cin_w, Cout, K, K2 = wt.shape
    assert Cin_w == Cin and K == K2, "weight shape mismatch"
    # TODO(synk): stride > 1 (zero-insertion upsampling) is not implemented; the module
    #             default (stride=1) is what this kernel covers.
    assert stride == 1, "this Pallas kernel implements the stride=1 cell only"
    q = K - 1 - padding
    assert q >= 0, "requires padding <= kernel - 1"

    out_dtype = jnp.dtype(x_nchw.dtype)
    if isinstance(compute_dtype, str) and compute_dtype == "auto":
        cdt = _default_compute_dtype(out_dtype)
    elif compute_dtype is None:
        cdt = out_dtype
    else:
        cdt = jnp.dtype(compute_dtype)

    sublane = 8 * max(1, 4 // cdt.itemsize)       # 8 (f32) / 16 (bf16)
    Cpad = _round_up(Cin, sublane)

    Hout = (H - 1) * stride - 2 * padding + K
    Wout = (W - 1) * stride - 2 * padding + K
    Wp = W + 2 * q

    budget = _vmem_budget_bytes()
    tco, bh = _select_tiling(Cout, Cpad, K, Wp, Hout, cdt.itemsize, out_dtype.itemsize,
                             budget, max_cout_tile, max_band_rows)

    n_bands = -(-Hout // bh)
    Cout_pad = _round_up(Cout, tco)
    c_blocks = Cout_pad // tco

    Lb = bh * Wp                                   # real lanes per band (incl. junk cols)
    Lpad = _round_up(Lb, 128)                      # lane-dense store width
    extra = -(-(K - 1 + (Lpad - Lb)) // Wp)        # rows so shifted slices stay in bounds
    Rb = bh + K - 1 + extra                        # rows per band slab (halo + overhang)
    Fb = Rb * Wp
    Hrows = (n_bands - 1) * bh + Rb

    # ConvTranspose2d(stride=1) == Conv2d with flipped, channel-swapped weights.
    w_flip = wt[:, :, ::-1, ::-1]                                  # (Cin, Cout, K, K)
    w_perm = jnp.transpose(w_flip, (1, 2, 3, 0))                   # (Cout, K, K, Cin)
    w_perm = jnp.pad(w_perm, ((0, Cout_pad - Cout), (0, 0), (0, 0), (0, Cpad - Cin)))
    w_conv = w_perm.reshape(Cout_pad, K * K * Cpad).astype(cdt)    # cols = (kh, kw, ci)
    bias_p = jnp.pad(bias.astype(jnp.float32), (0, Cout_pad - Cout)).reshape(Cout_pad, 1)

    # Single pad (channel round-up, q-pixel border, extra zero rows for band overhang).
    xp = jnp.pad(x_nchw.astype(cdt),
                 ((0, 0), (0, Cpad - Cin), (q, Hrows - q - H), (q, q)))  # (N,Cpad,Hrows,Wp)
    if n_bands == 1:
        xb = xp.reshape(N, 1, Cpad, Fb)            # free reshape, no gather
    else:
        idx = jnp.asarray((np.arange(n_bands)[:, None] * bh +
                           np.arange(Rb)[None, :]).reshape(-1), dtype=jnp.int32)
        xb = jnp.take(xp, idx, axis=2)             # (N, Cpad, n_bands*Rb, Wp)
        xb = xb.reshape(N, Cpad, n_bands, Rb, Wp)
        xb = jnp.transpose(xb, (0, 2, 1, 3, 4)).reshape(N, n_bands, Cpad, Fb)

    kern = functools.partial(_decnn2d_kernel, K=K, Wp=Wp, Lpad=Lpad, Cpad=Cpad)

    flops = 2 * N * n_bands * c_blocks * tco * (K * K * Cpad) * Lpad
    bytes_accessed = int(xb.size * cdt.itemsize + w_conv.size * cdt.itemsize
                         + bias_p.size * 4
                         + N * Cout_pad * n_bands * Lpad * out_dtype.itemsize)

    # TODO(synk): for tiny Cout with small N (few grid steps), block the batch axis on
    #             the lane dimension so one weight push serves several images per step.
    out_wide = pl.pallas_call(
        kern,
        out_shape=jax.ShapeDtypeStruct((N, Cout_pad, n_bands * Lpad), out_dtype),
        grid=(N, n_bands, c_blocks),
        in_specs=[
            pl.BlockSpec((1, 1, Cpad, Fb), lambda n, b, c: (n, b, 0, 0)),
            pl.BlockSpec((tco, K * K * Cpad), lambda n, b, c: (c, 0)),
            pl.BlockSpec((tco, 1), lambda n, b, c: (c, 0)),
        ],
        out_specs=pl.BlockSpec((1, tco, Lpad), lambda n, b, c: (n, c, b)),
        scratch_shapes=[pltpu.VMEM((K * K * Cpad, Lpad), cdt)],
        compiler_params=pltpu.CompilerParams(
            dimension_semantics=("parallel", "parallel", "arbitrary"),
            vmem_limit_bytes=int(budget),
        ),
        cost_estimate=pl.CostEstimate(flops=int(flops), transcendentals=0,
                                      bytes_accessed=bytes_accessed),
    )(xb, w_conv, bias_p)

    # Drop padded channels / junk lanes; result is already NCHW.
    out = out_wide.reshape(N, Cout_pad, n_bands, Lpad)[:, :Cout, :, :Lb]
    out = out.reshape(N, Cout, n_bands * bh, Wp)[:, :, :Hout, :Wout]
    return out


def _ref_deconv_stride1(x, wt, bias, padding):
    """Pure-numpy ConvTranspose2d(stride=1) reference."""
    x = np.asarray(x, np.float32)
    wt = np.asarray(wt, np.float32)
    bias = np.asarray(bias, np.float32)
    N, Cin, H, W = x.shape
    _, Cout, K, _ = wt.shape
    Hout = H - 2 * padding + K - 1
    Wout = W - 2 * padding + K - 1
    full = np.zeros((N, Cout, H + K - 1, W + K - 1), np.float32)
    for kh in range(K):
        for kw in range(K):
            contrib = np.einsum('nihw,io->nohw', x, wt[:, :, kh, kw])
            full[:, :, kh:kh + H, kw:kw + W] += contrib
    out = full[:, :, padding:padding + Hout, padding:padding + Wout]
    return out + bias[None, :, None, None]


if __name__ == "__main__":
    key = jax.random.PRNGKey(0)
    k_x, k_w, k_b, k_x2, k_w2, k_b2 = jax.random.split(key, 6)

    # Shapes consistent with the module defaults: kernel=3, stride=1, padding=1.
    N, Cin, H, W = 2, 4, 16, 16
    Cout, K, stride, padding = 8, 3, 1, 1

    bound = float(1.0 / np.sqrt(Cout * K * K))
    x = jax.random.normal(k_x, (N, Cin, H, W), jnp.float32)
    wt = jax.random.uniform(k_w, (Cin, Cout, K, K), jnp.float32, -bound, bound)
    bias = jax.random.uniform(k_b, (Cout,), jnp.float32, -bound, bound)
    ref = _ref_deconv_stride1(x, wt, bias, padding)

    # 1) f32 MXU operands, auto tiling (single band / single Cout block at this size).
    out = jax.block_until_ready(
        decnn2d_forward(x, wt, bias, stride=stride, padding=padding,
                        compute_dtype=jnp.float32))
    assert out.shape == ref.shape, (out.shape, ref.shape)
    assert np.allclose(np.asarray(out), ref, atol=1e-4, rtol=1e-4), "f32 mismatch"

    # 2) Exercise the halo'd row-band path, ragged last band, Cout padding and the
    #    pl.when(c == 0) patches-scratch reuse across several Cout blocks.
    Cout2 = 40
    bound2 = float(1.0 / np.sqrt(Cout2 * K * K))
    x2 = jax.random.normal(k_x2, (N, Cin, H, W), jnp.float32)
    wt2 = jax.random.uniform(k_w2, (Cin, Cout2, K, K), jnp.float32, -bound2, bound2)
    bias2 = jax.random.uniform(k_b2, (Cout2,), jnp.float32, -bound2, bound2)
    out2 = jax.block_until_ready(
        decnn2d_forward(x2, wt2, bias2, stride=stride, padding=padding,
                        compute_dtype=jnp.float32, max_cout_tile=16, max_band_rows=5))
    ref2 = _ref_deconv_stride1(x2, wt2, bias2, padding)
    assert out2.shape == ref2.shape, (out2.shape, ref2.shape)
    assert np.allclose(np.asarray(out2), ref2, atol=1e-4, rtol=1e-4), "banded mismatch"

    # 3) Default ("auto") compute dtype: bf16 MXU operands on v6e/v7x (f32 accumulation),
    #    f32 on older generations — relaxed tolerance covers the bf16 case.
    out3 = jax.block_until_ready(
        decnn2d_forward(x, wt, bias, stride=stride, padding=padding))
    assert np.allclose(np.asarray(out3), ref, atol=3e-2, rtol=3e-2), "auto-dtype mismatch"

    print("KERNEL_OK")
</pallas_src>

<mosaic_0001>
module attributes {stable_mosaic.version = 11 : i64} {
  func.func @_decnn2d_kernel(%arg0: i32, %arg1: i32, %arg2: i32, %arg3: memref<1x1x8x432xf32, #tpu.memory_space<vmem>>, %arg4: memref<8x72xf32, #tpu.memory_space<vmem>>, %arg5: memref<8x1xf32, #tpu.memory_space<vmem>>, %arg6: memref<1x8x384xf32, #tpu.memory_space<vmem>>, %arg7: memref<72x384xf32, #tpu.memory_space<vmem>>) attributes {dimension_semantics = [#tpu.dimension_semantics<parallel>, #tpu.dimension_semantics<parallel>, #tpu.dimension_semantics<arbitrary>], iteration_bounds = array<i64: 2, 1, 1>, scalar_prefetch = 0 : i64, scratch_operands = 1 : i64, tpu.core_type = #tpu.core_type<tc>, window_params = [{transform_indices = @transform_0, window_bounds = array<i64: 1, 1, 8, 432>}, {transform_indices = @transform_1, window_bounds = array<i64: 8, 72>}, {transform_indices = @transform_2, window_bounds = array<i64: 8, 1>}, {transform_indices = @transform_3, window_bounds = array<i64: 1, 8, 384>}]} {
    %c0_i32 = arith.constant 0 : i32
    %0 = arith.cmpi eq, %arg2, %c0_i32 : i32
    %1 = arith.extui %0 : i1 to i32
    %c0_i32_0 = arith.constant 0 : i32
    %2 = arith.cmpi ne, %1, %c0_i32_0 : i32
    scf.if %2 {
      %c0_9 = arith.constant 0 : index
      %c0_10 = arith.constant 0 : index
      %c0_11 = arith.constant 0 : index
      %c0_12 = arith.constant 0 : index
      %12 = vector.load %arg3[%c0_9, %c0_10, %c0_11, %c0_12] : memref<1x1x8x432xf32, #tpu.memory_space<vmem>>, vector<1x1x8x384xf32>
      %13 = vector.shape_cast %12 : vector<1x1x8x384xf32> to vector<8x384xf32>
      %c0_13 = arith.constant 0 : index
      %c0_14 = arith.constant 0 : index
      %14 = vector.load %arg7[%c0_13, %c0_14] : memref<72x384xf32, #tpu.memory_space<vmem>>, vector<8x384xf32>
      tpu.vector_store %arg7[%c0_13, %c0_14], %13 {strides = array<i32>} : memref<72x384xf32, #tpu.memory_space<vmem>>, vector<8x384xf32>,
      %c0_15 = arith.constant 0 : index
      %c0_16 = arith.constant 0 : index
      %c0_17 = arith.constant 0 : index
      %c1 = arith.constant 1 : index
      %15 = vector.load %arg3[%c0_15, %c0_16, %c0_17, %c1] : memref<1x1x8x432xf32, #tpu.memory_space<vmem>>, vector<1x1x8x384xf32>
      %16 = vector.shape_cast %15 : vector<1x1x8x384xf32> to vector<8x384xf32>
      %c8 = arith.constant 8 : index
      %c0_18 = arith.constant 0 : index
      %17 = vector.load %arg7[%c8, %c0_18] : memref<72x384xf32, #tpu.memory_space<vmem>>, vector<8x384xf32>
      tpu.vector_store %arg7[%c8, %c0_18], %16 {strides = array<i32>} : memref<72x384xf32, #tpu.memory_space<vmem>>, vector<8x384xf32>,
      %c0_19 = arith.constant 0 : index
      %c0_20 = arith.constant 0 : index
      %c0_21 = arith.constant 0 : index
      %c2 = arith.constant 2 : index
      %18 = vector.load %arg3[%c0_19, %c0_20, %c0_21, %c2] : memref<1x1x8x432xf32, #tpu.memory_space<vmem>>, vector<1x1x8x384xf32>
      %19 = vector.shape_cast %18 : vector<1x1x8x384xf32> to vector<8x384xf32>
      %c16 = arith.constant 16 : index
      %c0_22 = arith.constant 0 : index
      %20 = vector.load %arg7[%c16, %c0_22] : memref<72x384xf32, #tpu.memory_space<vmem>>, vector<8x384xf32>
      tpu.vector_store %arg7[%c16, %c0_22], %19 {strides = array<i32>} : memref<72x384xf32, #tpu.memory_space<vmem>>, vector<8x384xf32>,
      %c0_23 = arith.constant 0 : index
      %c0_24 = arith.constant 0 : index
      %c0_25 = arith.constant 0 : index
      %c18 = arith.constant 18 : index
      %21 = vector.load %arg3[%c0_23, %c0_24, %c0_25, %c18] : memref<1x1x8x432xf32, #tpu.memory_space<vmem>>, vector<1x1x8x384xf32>
      %22 = vector.shape_cast %21 : vector<1x1x8x384xf32> to vector<8x384xf32>
      %c24 = arith.constant 24 : index
      %c0_26 = arith.constant 0 : index
      %23 = vector.load %arg7[%c24, %c0_26] : memref<72x384xf32, #tpu.memory_space<vmem>>, vector<8x384xf32>
      tpu.vector_store %arg7[%c24, %c0_26], %22 {strides = array<i32>} : memref<72x384xf32, #tpu.memory_space<vmem>>, vector<8x384xf32>,
      %c0_27 = arith.constant 0 : index
      %c0_28 = arith.constant 0 : index
      %c0_29 = arith.constant 0 : index
      %c19 = arith.constant 19 : index
      %24 = vector.load %arg3[%c0_27, %c0_28, %c0_29, %c19] : memref<1x1x8x432xf32, #tpu.memory_space<vmem>>, vector<1x1x8x384xf32>
      %25 = vector.shape_cast %24 : vector<1x1x8x384xf32> to vector<8x384xf32>
      %c32 = arith.constant 32 : index
      %c0_30 = arith.constant 0 : index
      %26 = vector.load %arg7[%c32, %c0_30] : memref<72x384xf32, #tpu.memory_space<vmem>>, vector<8x384xf32>
      tpu.vector_store %arg7[%c32, %c0_30], %25 {strides = array<i32>} : memref<72x384xf32, #tpu.memory_space<vmem>>, vector<8x384xf32>,
      %c0_31 = arith.constant 0 : index
      %c0_32 = arith.constant 0 : index
      %c0_33 = arith.constant 0 : index
      %c20 = arith.constant 20 : index
      %27 = vector.load %arg3[%c0_31, %c0_32, %c0_33, %c20] : memref<1x1x8x432xf32, #tpu.memory_space<vmem>>, vector<1x1x8x384xf32>
      %28 = vector.shape_cast %27 : vector<1x1x8x384xf32> to vector<8x384xf32>
      %c40 = arith.constant 40 : index
      %c0_34 = arith.constant 0 : index
      %29 = vector.load %arg7[%c40, %c0_34] : memref<72x384xf32, #tpu.memory_space<vmem>>, vector<8x384xf32>
      tpu.vector_store %arg7[%c40, %c0_34], %28 {strides = array<i32>} : memref<72x384xf32, #tpu.memory_space<vmem>>, vector<8x384xf32>,
      %c0_35 = arith.constant 0 : index
      %c0_36 = arith.constant 0 : index
      %c0_37 = arith.constant 0 : index
      %c36 = arith.constant 36 : index
      %30 = vector.load %arg3[%c0_35, %c0_36, %c0_37, %c36] : memref<1x1x8x432xf32, #tpu.memory_space<vmem>>, vector<1x1x8x384xf32>
      %31 = vector.shape_cast %30 : vector<1x1x8x384xf32> to vector<8x384xf32>
      %c48 = arith.constant 48 : index
      %c0_38 = arith.constant 0 : index
      %32 = vector.load %arg7[%c48, %c0_38] : memref<72x384xf32, #tpu.memory_space<vmem>>, vector<8x384xf32>
      tpu.vector_store %arg7[%c48, %c0_38], %31 {strides = array<i32>} : memref<72x384xf32, #tpu.memory_space<vmem>>, vector<8x384xf32>,
      %c0_39 = arith.constant 0 : index
      %c0_40 = arith.constant 0 : index
      %c0_41 = arith.constant 0 : index
      %c37 = arith.constant 37 : index
      %33 = vector.load %arg3[%c0_39, %c0_40, %c0_41, %c37] : memref<1x1x8x432xf32, #tpu.memory_space<vmem>>, vector<1x1x8x384xf32>
      %34 = vector.shape_cast %33 : vector<1x1x8x384xf32> to vector<8x384xf32>
      %c56 = arith.constant 56 : index
      %c0_42 = arith.constant 0 : index
      %35 = vector.load %arg7[%c56, %c0_42] : memref<72x384xf32, #tpu.memory_space<vmem>>, vector<8x384xf32>
      tpu.vector_store %arg7[%c56, %c0_42], %34 {strides = array<i32>} : memref<72x384xf32, #tpu.memory_space<vmem>>, vector<8x384xf32>,
      %c0_43 = arith.constant 0 : index
      %c0_44 = arith.constant 0 : index
      %c0_45 = arith.constant 0 : index
      %c38 = arith.constant 38 : index
      %36 = vector.load %arg3[%c0_43, %c0_44, %c0_45, %c38] : memref<1x1x8x432xf32, #tpu.memory_space<vmem>>, vector<1x1x8x384xf32>
      %37 = vector.shape_cast %36 : vector<1x1x8x384xf32> to vector<8x384xf32>
      %c64 = arith.constant 64 : index
      %c0_46 = arith.constant 0 : index
      %38 = vector.load %arg7[%c64, %c0_46] : memref<72x384xf32, #tpu.memory_space<vmem>>, vector<8x384xf32>
      tpu.vector_store %arg7[%c64, %c0_46], %37 {strides = array<i32>} : memref<72x384xf32, #tpu.memory_space<vmem>>, vector<8x384xf32>,
    } else {
    }
    %c0 = arith.constant 0 : index
    %c0_1 = arith.constant 0 : index
    %3 = vector.load %arg4[%c0, %c0_1] : memref<8x72xf32, #tpu.memory_space<vmem>>, vector<8x72xf32>
    %c0_2 = arith.constant 0 : index
    %c0_3 = arith.constant 0 : index
    %4 = vector.load %arg7[%c0_2, %c0_3] : memref<72x384xf32, #tpu.memory_space<vmem>>, vector<72x384xf32>
    %cst = arith.constant dense<0.000000e+00> : vector<8x384xf32>
    %5 = tpu.matmul %3, %4, %cst {dimension_numbers = #tpu.dot_dimension_numbers<[1], [0], [0], [1], [0, 0, 1, 1], [], []>} : vector<8x72xf32>, vector<72x384xf32>, vector<8x384xf32> -> vector<8x384xf32>
    %c0_4 = arith.constant 0 : index
    %c0_5 = arith.constant 0 : index
    %6 = vector.load %arg5[%c0_4, %c0_5] : memref<8x1xf32, #tpu.memory_space<vmem>>, vector<8x1xf32>
    %7 = vector.broadcast %6 : vector<8x1xf32> to vector<8x384xf32>
    %8 = arith.addf %5, %7 : vector<8x384xf32>
    %c0_6 = arith.constant 0 : index
    %c0_7 = arith.constant 0 : index
    %c0_8 = arith.constant 0 : index
    %9 = vector.load %arg6[%c0_6, %c0_7, %c0_8] : memref<1x8x384xf32, #tpu.memory_space<vmem>>, vector<1x8x384xf32>
    %10 = vector.shape_cast %9 : vector<1x8x384xf32> to vector<8x384xf32>
    %11 = vector.shape_cast %8 : vector<8x384xf32> to vector<1x8x384xf32>
    tpu.vector_store %arg6[%c0_6, %c0_7, %c0_8], %11 {strides = array<i32>} : memref<1x8x384xf32, #tpu.memory_space<vmem>>, vector<1x8x384xf32>,
    return
  }
  func.func @transform_0(%arg0: i32, %arg1: i32, %arg2: i32) -> (i32, i32, i32, i32) {
    %c0_i32 = arith.constant 0 : i32
    %c0_i32_0 = arith.constant 0 : i32
    %c0_i32_1 = arith.constant 0 : i32
    return %arg0, %arg1, %c0_i32, %c0_i32_0 : i32, i32, i32, i32
  }
  func.func @transform_1(%arg0: i32, %arg1: i32, %arg2: i32) -> (i32, i32) {
    %c0_i32 = arith.constant 0 : i32
    %c0_i32_0 = arith.constant 0 : i32
    return %arg2, %c0_i32 : i32, i32
  }
  func.func @transform_2(%arg0: i32, %arg1: i32, %arg2: i32) -> (i32, i32) {
    %c0_i32 = arith.constant 0 : i32
    %c0_i32_0 = arith.constant 0 : i32
    return %arg2, %c0_i32 : i32, i32
  }
  func.func @transform_3(%arg0: i32, %arg1: i32, %arg2: i32) -> (i32, i32, i32) {
    %c0_i32 = arith.constant 0 : i32
    return %arg0, %arg2, %arg1 : i32, i32, i32
  }
}

</mosaic_0001>

<bundles_post_ra>
// kernel: tpu_custom_call.1
= control target key start
LH: loop header
LB: loop body
LE: loop exit
PB: predicated region body
PF: predicated region fallthrough
CT: control target
= control target key end

     0   :  { %8 = vsyncpa [#allocation4], 0  ;;  %s1378_s0 = inlined_call_operand.hbm [shape: f32[2,1,8,432], index: 0, kind: input, shape index: {}]   ;;  %s1379_s1 = inlined_call_operand.vmem [shape: f32[8,72], index: 1, kind: input, shape index: {}]   ;;  %s1380_s2 = inlined_call_operand.vmem [shape: f32[8,1], index: 2, kind: input, shape index: {}]   ;;  %s1381_s3 = inlined_call_operand.hbm [shape: f32[2,8,384], index: 3, kind: output, shape index: {}]  }
   0x1   :  { %10 = vsyncpa [#allocation4 + $0x1], 0 }
   0x2   :  { %11 = vsyncpa [#allocation5], 0 }
   0x3   :  { %13 = vsyncpa [#allocation5 + $0x1], 0  ;;  %s1158_s12 = smov 0   ;;  %s1160_s13 = smov 0  }
   0x4   :  { %s1162_s14 = smov 0   ;;  %s1164_s15 = smov 0  }
   0x5   :  { %s1166_s16 = smov 0   ;;  %s1168_s17 = smov 0  }
   0x6 LB: > { %s787_s18 = sadd.s32 4294967295, %s1122_s17   ;;  %s788_s19 = sadd.s32 4294967294, %s1122_s17   ;;  %s1122_s17 = sphi %s1168_s17, %s19_s17   ;;  %s1118_s16 = sphi %s1166_s16, %s1397_s16   ;;  %s1114_s15 = sphi %s1164_s15, %s1396_s15   ;;  %s1110_s14 = sphi %s1162_s14, %s1395_s14   ;;  %s1106_s13 = sphi %s1160_s13, %s1394_s13   ;;  %s1102_s12 = sphi %s1158_s12, %s1393_s12  }
   0x7   : > { %s38_s20 = sadd.s32 1, %s1118_s16  ;;  %s47_s21 = sadd.s32 1, %s1110_s14 }
   0x8   : > { %p40_p0 = scmp.ge.s32.totalorder %s38_s20, 2  ;;  %p54_p1 = scmp.ne.s32.totalorder %s1110_s14, %s1106_s13 }
   0x9   : > { %p55_p2 = scmp.eq.s32.totalorder %s1122_s17, 0  ;;  %p60_p3 = scmp.ne.s32.totalorder %s1106_s13, %s1102_s12 }
   0xa   : > { %s1399_s20 = smov (%p40_p0, %s38_s20), 0  ;;  %p61_p5 = scmp.eq.s32.totalorder %s787_s18, 0 }
   0xb   : > { %p1199_p4 = por %p55_p2, %p54_p1  ;;  %s42_s23 = ssub.s32 %s1118_s16, %s1399_s20 }
   0xc   : > { %p140_p6 = scmp.eq.s32.totalorder %s787_s18, 1  ;;  %p45_p7 = scmp.eq.s32.totalorder %s42_s23, 0 }
   0xd   : > { %p1205_p8 = por %p61_p5, %p60_p3  ;;  %p146_p10 = scmp.eq.s32.totalorder %s788_s19, 1 }
   0xe   : > { %p1209_p9 = por %p140_p6, %p54_p1  ;;  %p877_p13 = scmp.lt.s32.totalorder %s1122_s17, 2 }
   0xf   : > { %s1214_s26 = scalar_select %p45_p7, %s1110_s14, %s47_s21  }
  0x10   : > { %s1385_s25 = scalar_select %p1209_p9, 1, 0 }
  0x11   : > { %p1216_p11 = por %p146_p10, %p60_p3  ;;  %s180_s28 = sand.u32 1, %s1110_s14  }
  0x12   : > { %s793_s29 = sshll.u32 %s180_s28, 5  ;;  %s803_s30 = sshll.u32 %s1118_s16, 9 }
  0x13   : > { %s1386_s27 = scalar_select %p1216_p11, 1, 0 }
  0x14   : > { %s1227_s6 = scalar_lea.hbm %s1378_s0, %s803_s30  ;;  %s184_s7 = scalar_lea.vmem [#allocation3], %s793_s29 }
  0x15   : > { %s194_s8 = sshll.u32 %s184_s7, 4  ;;  %p1233_p0 = pnand %p877_p13, %p1199_p4  ;;  %s1229_s8 = int_to_ptr.vmem [resolvable:$true] %s194_s8 }
  0x16   : > { %s181_s10 = scalar_lea.sflag [#allocation4], %s180_s28  ;;  %s1010_s11 = scalar_lea.hbm %s1227_s6, 512 }
  0x17   : > { %p1011_p3 = scmp.ne.s32.totalorder %s1227_s6, %s1010_s11  ;;  %p1012_p5 = pneg %p1233_p0 }
  0x18   : > { %s1015_s21 = scalar_lea.hbm %s1378_s0, 1024  ;;  %p1016_p4 = scmp.lt.u32.totalorder %s1227_s6, %s1378_s0 }
  0x19   : > { %p1013_p6 = pnand %p1012_p5, %p1011_p3  ;;  %p1017_p10 = scmp.lt.u32.totalorder %s1015_s21, %s1010_s11 }
  0x1a   : > { %p1019_p12 = scmp.lt.u32.totalorder %s1010_s11, %s1227_s6 }
  0x1b   : > { %p1014_p7 = pneg %p1013_p6  ;;  %p1018_p13 = por %p1017_p10, %p1016_p4 }
  0x1d   : > { %p1020_p1 = por %p1019_p12, %p1018_p13 }
  0x1f   : > { %p1021_p2 = pnand %p1020_p1, %p1014_p7 }
  0x21   : > { %1024 = shalt.err (!%p1021_p2)
}
  0x22   : > { %s1025_s28 = scalar_lea.vmem %s1229_s8, 512  ;;  %s1124_s29 = smov [#allocation3]  }
  0x23   : > { %p1026_p3 = scmp.ne.s32.totalorder %s1229_s8, %s1025_s28  ;;  %s1030_s30 = sshll.u32 %s1124_s29, 4  ;;  %s1031_s30 = int_to_ptr.vmem [resolvable:$false] %s1030_s30 }
  0x24   : > { %s1032_s4 = scalar_lea.vmem %s1031_s30, 1024  ;;  %p1033_p9 = scmp.lt.s32.totalorder %s1229_s8, %s1031_s30 }
  0x25   : > { %p1028_p6 = pnand %p1026_p3, %p1012_p5  ;;  %p1034_p4 = scmp.lt.s32.totalorder %s1032_s4, %s1025_s28 }
  0x27   : > { %p1029_p11 = pneg %p1028_p6  ;;  %p1035_p10 = por %p1034_p4, %p1033_p9 }
  0x29   : > { %p1036_p12 = pnand %p1035_p10, %p1029_p11 }
  0x2b   : > { %1039 = shalt.err (!%p1036_p12)
}
  0x2c   : > { %872 = dma.hbm_to_vmem [thread:$0]  (!%p1233_p0), %s1227_s6, 512, %s1229_s8, %s181_s10  }
  0x2d   : > { %p1388_p1 = scmp.lt.s32.totalorder %s1122_s17, 3  ;;  %p1389_p2 = scmp.ge.s32.totalorder %s1122_s17, 1 }
  0x2f   : > { %p200_p5 = pnand %p1389_p2, %p1388_p1 }
  0x30   : > { %s1269_s5 = sand.u32 (!%p200_p5), 1, %s1106_s13  }
  0x31   : > { %203 = sbr.rel (%p200_p5) target bundleno = 438 (0x1b6), region = 32  ;;  %s797_s7 = sshll.u32 (!%p200_p5), %s1269_s5, 5 }
  0x32   : > { %s206_s11 = scalar_lea.sflag (!%p200_p5), [#allocation4], %s1269_s5  ;;  %s209_s18 = scalar_lea.vmem (!%p200_p5), [#allocation3], %s797_s7 }
  0x38   : > { %1093 = dma.done.wait (%p1205_p8), %s206_s11, 512  }
  0x39   : > { %1095 = vsyncadd (%p1205_p8), %s206_s11, 4294966784  ;;  %v1125_v0 = vmov 0.0|0.0   ;;  %v286_v1 = vld [vmem:[%s209_s18 + $0x8] sm:$0xff]  ;;  %v1278_v2 = vld [vmem:[%s209_s18 + $0x10] sm:$0xff]  ;;  %s1126_s6 = smov 126   ;;  %s1127_s8 = smov 127  }
  0x3a   : > { %851 = vmatprep.subr.bf16.mxu1 %v1125_v0  ;;  %v1280_v3 = vld [vmem:[%s209_s18] sm:$0xff]  ;;  %v949_v4 = vpack.i.bf16 %v1278_v2, %v286_v1  ;;  %v262_v5 = vld [vmem:[%s209_s18 + $0x18] sm:$0xff]  ;;  %s1128_s9 = smov 110   ;;  %s1129_s24 = smov 108   ;;  %v1131_v7 = vmov 0.0   ;;  %vm1134_vm0 = vmmov 0  }
  0x3b   : > { %v944_v6 = vpack.i.bf16 %v262_v5, %v1280_v3  ;;  %s1130_s10 = smov 109   ;;  %569 = vmatprep.mubr.f32.mxu0 %v1131_v7  ;;  %s1132_s19 = smov 91   ;;  %832 = vmatprep.mubr.msk.f32.mxu1 %vm1134_vm0, %v1131_v7  ;;  %v1135_v8 = vmov 0   ;;  %v495_v9 = vld [vmem:[%s1380_s2] sm:$0xff]  ;;  %vm275_vm1 = vcmask 1039360   ;;  %vm301_vm2 = vcmask 1031168  }
  0x3c   : > { %950 = vrot.lane.b32.xlu1 %v949_v4, %s1126_s6  ;;  %940 = vrot.lane.b32.xlu0 %v949_v4, %s1127_s8  ;;  %s1133_s21 = smov 92   ;;  %s1136_s22 = smov 90   ;;  %vm327_vm3 = vcmask 900096   ;;  %vm353_vm4 = vcmask 891904   ;;  %vm379_vm5 = vcmask 883712   ;;  %vm405_vm6 = vcmask 752640  }
  0x3d   : > { %1009 = vset.pattern.permute.xlu0 %v1135_v8  ;;  %vm431_vm7 = vcmask 744448   ;;  %vm457_vm8 = vcmask 736256   ;;  %vm501_vm9 = vcmask 588800   ;;  %s863_s4 = smul.u32 24, %s1269_s5  ;;  %p1390_p9 = scmp.ne.s32.totalorder %s1385_s25, 0 }
  0x3e   : > { %s864_s7 = smul.u32 384, %s1114_s15  ;;  %s650_s15 = scalar_lea.sflag [#allocation5], %s1269_s5 }
  0x3f   : > { %s239_s11 = scalar_lea.vmem [#allocation6], %s863_s4 }
  0x40   : > { %955 = vrot.lane.b32.xlu1 %v949_v4, %s1128_s9  ;;  %945 = vrot.lane.b32.xlu0 %v944_v6, %s1127_s8  ;;  %s668_s18 = sshll.u32 %s239_s11, 4  ;;  %s1331_s18 = int_to_ptr.vmem [resolvable:$true] %s668_s18 }
  0x44   : > { %965 = vrot.lane.b32.xlu1 %v944_v6, %s1128_s9  ;;  %960 = vrot.lane.b32.xlu0 %v944_v6, %s1126_s6  ;;  %s1329_s9 = scalar_lea.hbm %s1381_s3, %s864_s7 }
  0x48   : > { %975 = vrot.lane.b32.xlu1 %v949_v4, %s1129_s24  ;;  %970 = vrot.lane.b32.xlu0 %v949_v4, %s1130_s10 }
  0x4c   : > { %985 = vrot.lane.b32.xlu1 %v944_v6, %s1129_s24  ;;  %980 = vrot.lane.b32.xlu0 %v944_v6, %s1130_s10  ;;  %s1040_s24 = scalar_lea.vmem %s1331_s18, 384  ;;  %s1137_s10 = smov [#allocation6]  }
  0x4d   : > { %p1041_p8 = scmp.ne.s32.totalorder %s1331_s18, %s1040_s24 }
  0x4f   : > { %p1042_p11 = pnand %p1041_p8, %p1390_p9 }
  0x50   : > { %995 = vrot.lane.b32.xlu1 %v949_v4, %s1132_s19  ;;  %990 = vrot.lane.b32.xlu0 %v949_v4, %s1133_s21 }
  0x51   : > { %p1043_p0 = pneg %p1042_p11 }
  0x54   : > { %1005 = vrot.lane.b32.xlu1 %v944_v6, %s1132_s19  ;;  %1000 = vrot.lane.b32.xlu0 %v944_v6, %s1133_s21  ;;  %s1044_s19 = sshll.u32 %s1137_s10, 4  ;;  %s1045_s19 = int_to_ptr.vmem [resolvable:$false] %s1044_s19 }
  0x55   : > { %s1046_s21 = scalar_lea.vmem %s1045_s19, 768  ;;  %p1047_p7 = scmp.lt.s32.totalorder %s1331_s18, %s1045_s19 }
  0x56   : > { %p1048_p13 = scmp.lt.s32.totalorder %s1046_s21, %s1040_s24 }
  0x58   : > { %453 = vrot.lane.b32.xlu1 %v1278_v2, %s1136_s22  ;;  %451 = vrot.lane.b32.xlu0 %v286_v1, %s1136_s22  ;;  %p1049_p3 = por %p1048_p13, %p1047_p7 }
  0x5a   : > { %p1050_p6 = pnand %p1049_p3, %p1043_p0 }
  0x5c   : > { %455 = vrot.lane.b32.xlu1 %v262_v5, %s1136_s22  ;;  %449 = vrot.lane.b32.xlu0 %v1280_v3, %s1136_s22 }
  0x60   : > { %498 = vperm.xlu0 %1009, %v495_v9  }
  0xae   : > { %v951_v10 = vpop.permute.xlu1 %950  ;;  %v941_v11 = vpop.permute.xlu0 %940 }
  0xaf   : > { %v943_v12 = vunpack.i.h.bf16 %v941_v11  ;;  %v942_v13 = vunpack.i.l.bf16 %v941_v11  ;;  %v953_v14 = vunpack.i.h.bf16 %v951_v10  ;;  %v952_v15 = vunpack.i.l.bf16 %v951_v10 }
  0xb1   : > { %v277_v16 = vsel %vm275_vm1, %v942_v13, %v943_v12  ;;  %v303_v26 = vsel %vm301_vm2, %v952_v15, %v953_v14 }
  0xb2   : > { %v956_v17 = vpop.permute.xlu1 %955  ;;  %v946_v18 = vpop.permute.xlu0 %945  ;;  %v835_v19 = vpack.c.bf16 %v277_v16, %v286_v1 }
  0xb3   : > { %v958_v20 = vunpack.i.h.bf16 %v956_v17  ;;  %v957_v21 = vunpack.i.l.bf16 %v956_v17  ;;  %v948_v22 = vunpack.i.h.bf16 %v946_v18  ;;  %v947_v23 = vunpack.i.l.bf16 %v946_v18 }
  0xb4   : > { %836 = vmatprep.subr.bf16.mxu0 %v835_v19 }
  0xb5   : > { %v276_v24 = vsel %vm275_vm1, %v947_v23, %v942_v13  ;;  %v278_v25 = vsel %vm275_vm1, %v943_v12, %v948_v22  ;;  %v329_v27 = vsel %vm327_vm3, %v957_v21, %v958_v20 }
  0xb6   : > { %v966_v28 = vpop.permute.xlu1 %965  ;;  %v961_v29 = vpop.permute.xlu0 %960  ;;  %v837_v30 = vpack.c.bf16 %v276_v24, %v1280_v3  ;;  %v852_v31 = vpack.c.bf16 %v278_v25, %v1278_v2  ;;  %v839_v32 = vpack.c.bf16 %v329_v27, %v303_v26  ;;  %v467_v27 = vld [vmem:[%s1379_s1] sm:$0xff] }
  0xb7   : > { %v968_v33 = vunpack.i.h.bf16 %v966_v28  ;;  %v967_v34 = vunpack.i.l.bf16 %v966_v28  ;;  %v963_v35 = vunpack.i.h.bf16 %v961_v29  ;;  %v962_v36 = vunpack.i.l.bf16 %v961_v29 }
  0xb8   : > { %838 = vmatpush1.bf16.msra.mxu0 %v837_v30  ;;  %853 = vmatpush3.bf16.msra.mxu1 %v852_v31 }
  0xb9   : > { %840 = vmatprep.subr.bf16.mxu0 %v839_v32  ;;  %854 = vmatprep.subr.bf16.mxu1 %v1125_v0  ;;  %v302_v37 = vsel %vm301_vm2, %v962_v36, %v952_v15  ;;  %v328_v38 = vsel %vm327_vm3, %v967_v34, %v957_v21  ;;  %v304_v39 = vsel %vm301_vm2, %v953_v14, %v963_v35 }
  0xba   : > { %v976_v40 = vpop.permute.xlu1 %975  ;;  %v971_v41 = vpop.permute.xlu0 %970  ;;  %v841_v42 = vpack.c.bf16 %v328_v38, %v302_v37  ;;  %v330_v43 = vsel %vm327_vm3, %v958_v20, %v968_v33 }
  0xbb   : > { %v978_v44 = vunpack.i.h.bf16 %v976_v40  ;;  %v977_v45 = vunpack.i.l.bf16 %v976_v40  ;;  %v973_v46 = vunpack.i.h.bf16 %v971_v41  ;;  %v972_v47 = vunpack.i.l.bf16 %v971_v41 }
  0xbc   : > { %842 = vmatpush1.bf16.msra.mxu0 %v841_v42  ;;  %v855_v48 = vpack.c.bf16 %v330_v43, %v304_v39 }
  0xbd   : > { %v355_v49 = vsel %vm353_vm4, %v972_v47, %v973_v46  ;;  %v381_v50 = vsel %vm379_vm5, %v977_v45, %v978_v44 }
  0xbe   : > { %856 = vmatpush3.bf16.msra.mxu1 %v855_v48  ;;  %v986_v51 = vpop.permute.xlu1 %985  ;;  %v981_v52 = vpop.permute.xlu0 %980  ;;  %v843_v53 = vpack.c.bf16 %v381_v50, %v355_v49 }
  0xbf   : > { %v988_v54 = vunpack.i.h.bf16 %v986_v51  ;;  %v987_v55 = vunpack.i.l.bf16 %v986_v51  ;;  %v983_v56 = vunpack.i.h.bf16 %v981_v52  ;;  %v982_v57 = vunpack.i.l.bf16 %v981_v52  ;;  %857 = vmatprep.subr.bf16.mxu1 %v1125_v0 }
  0xc0   : > { %844 = vmatprep.subr.bf16.mxu0 %v843_v53 }
  0xc1   : > { %v354_v58 = vsel %vm353_vm4, %v982_v57, %v972_v47  ;;  %v380_v59 = vsel %vm379_vm5, %v987_v55, %v977_v45  ;;  %v356_v60 = vsel %vm353_vm4, %v973_v46, %v983_v56  ;;  %v382_v61 = vsel %vm379_vm5, %v978_v44, %v988_v54 }
  0xc2   : > { %v996_v62 = vpop.permute.xlu1 %995  ;;  %v991_v63 = vpop.permute.xlu0 %990  ;;  %v845_v1 = vpack.c.bf16 %v380_v59, %v354_v58  ;;  %v858_v2 = vpack.c.bf16 %v382_v61, %v356_v60 }
  0xc3   : > { %v998_v3 = vunpack.i.h.bf16 %v996_v62  ;;  %v997_v4 = vunpack.i.l.bf16 %v996_v62  ;;  %v993_v5 = vunpack.i.h.bf16 %v991_v63  ;;  %v992_v6 = vunpack.i.l.bf16 %v991_v63 }
  0xc4   : > { %846 = vmatpush1.bf16.msra.mxu0 %v845_v1  ;;  %859 = vmatpush3.bf16.msra.mxu1 %v858_v2 }
  0xc5   : > { %v407_v8 = vsel %vm405_vm6, %v992_v6, %v993_v5  ;;  %v433_v9 = vsel %vm431_vm7, %v997_v4, %v998_v3  ;;  %860 = vmatprep.subr.bf16.mxu1 %v1125_v0 }
  0xc6   : > { %v1006_v10 = vpop.permute.xlu1 %1005  ;;  %v1001_v11 = vpop.permute.xlu0 %1000  ;;  %v847_v12 = vpack.c.bf16 %v433_v9, %v407_v8 }
  0xc7   : > { %v1008_v13 = vunpack.i.h.bf16 %v1006_v10  ;;  %v1007_v14 = vunpack.i.l.bf16 %v1006_v10  ;;  %v1003_v15 = vunpack.i.h.bf16 %v1001_v11  ;;  %v1002_v16 = vunpack.i.l.bf16 %v1001_v11 }
  0xc8   : > { %848 = vmatprep.subr.bf16.mxu0 %v847_v12 }
  0xc9   : > { %v406_v17 = vsel %vm405_vm6, %v1002_v16, %v992_v6  ;;  %v432_v18 = vsel %vm431_vm7, %v1007_v14, %v997_v4  ;;  %v408_v19 = vsel %vm405_vm6, %v993_v5, %v1003_v15  ;;  %v434_v20 = vsel %vm431_vm7, %v998_v3, %v1008_v13 }
  0xca   : > { %v454_v21 = vpop.permute.xlu1 %453  ;;  %v452_v22 = vpop.permute.xlu0 %451  ;;  %v849_v0 = vpack.c.bf16 %v432_v18, %v406_v17  ;;  %v861_v23 = vpack.c.bf16 %v434_v20, %v408_v19 }
  0xcb   : > { %v459_v24 = vsel %vm457_vm8, %v452_v22, %v454_v21 }
  0xcc   : > { %850 = vmatpush1.bf16.msra.mxu0 %v849_v0  ;;  %862 = vmatpush3.bf16.msra.mxu1 %v861_v23 }
  0xcd   : > { %521 = vmatprep.subr.mxu0 %v459_v24  ;;  %830 = vmatprep.subr.mxu1 %v1131_v7 }
  0xce   : > { %v456_v25 = vpop.permute.xlu1 %455  ;;  %v450_v26 = vpop.permute.xlu0 %449 }
  0xcf   : > { %v458_v28 = vsel %vm457_vm8, %v450_v26, %v452_v22  ;;  %v460_v29 = vsel %vm457_vm8, %v454_v21, %v456_v25 }
  0xd0   : > { %522 = vmatpush1.msra.mxu0 %v458_v28  ;;  %831 = vmatpush3.msra.mxu1 %v460_v29 }
  0xd1   : > { %798 = vmatmul.mubr.msk.f32.vlgmr.msra.gmra.mrb[0].mxu0 %vm501_vm9, %v467_v27  ;;  %833 = vmatmul.mubr.msk.f32.vlgmr.msra.gmra.mrb[0].mxu1 %vm501_vm9, %v467_v27 }
  0xdf   : > { %v499_v30 = vpop.permute.xlu0 %498 }
 0x1a4   : > { %v571_v7 = vpop.f32.mrb[0].mxu0  ;;  %v642_v31 = vpop.f32.mrb[0].mxu1 }
 0x1a5   : > { %v572_v32 = vadd.f32 %v571_v7, %v499_v30  ;;  %v643_v33 = vadd.f32 %v642_v31, %v499_v30  ;;  %v573_v34 = vpop.f32.mrb[1].mxu0  ;;  %v834_v35 = vpop.f32.mrb[1].mxu1 }
 0x1a6   : > { %v574_v36 = vadd.f32 %v573_v34, %v499_v30 }
 0x1a7   : > { %646 = vst [vmem:[%s239_s11] sm:$0xff] %v572_v32  ;;  %648 = vst [vmem:[%s239_s11 + $0x10] sm:$0xff] %v643_v33 }
 0x1a8   : > { %647 = vst [vmem:[%s239_s11 + $0x8] sm:$0xff] %v574_v36 }
 0x1a9   : > { %1053 = shalt.err (!%p1050_p6)
}
 0x1aa   : > { %s1054_s5 = scalar_lea.hbm %s1329_s9, 384  ;;  %s1058_s28 = scalar_lea.hbm %s1381_s3, 768 }
 0x1ab   : > { %p1055_p4 = scmp.ne.s32.totalorder %s1329_s9, %s1054_s5  ;;  %p1059_p1 = scmp.lt.u32.totalorder %s1329_s9, %s1381_s3 }
 0x1ac   : > { %p1060_p2 = scmp.lt.u32.totalorder %s1058_s28, %s1054_s5  ;;  %p1062_p8 = scmp.lt.u32.totalorder %s1054_s5, %s1329_s9 }
 0x1ad   : > { %p1056_p10 = pnand %p1055_p4, %p1390_p9 }
 0x1ae   : > { %p1061_p5 = por %p1060_p2, %p1059_p1 }
 0x1af   : > { %p1057_p12 = pneg %p1056_p10 }
 0x1b0   : > { %p1063_p11 = por %p1062_p8, %p1061_p5 }
 0x1b2   : > { %p1064_p0 = pnand %p1063_p11, %p1057_p12 }
 0x1b4   : > { %1067 = shalt.err (!%p1064_p0)
}
 0x1b5   : > { %867 = dma.vmem_to_hbm [thread:$0]  (%p1390_p9), %s1331_s18, 384, %s1329_s9, %s650_s15  }
 0x1b6 PF: > { %s680_s4 = sand.u32 1, %s1102_s12   ;;  %p1391_p7 = scmp.ne.s32.totalorder %s1386_s27, 0 }
 0x1b7   : > { %p1392_p13 = scmp.ge.s32.totalorder %s1122_s17, 2  ;;  %s681_s7 = scalar_lea.sflag [#allocation5], %s680_s4 }
 0x1b9   : > { %p874_p3 = pnand %p1392_p13, %p1391_p7 }
 0x1bb   : > { %1097 = dma.done.wait (!%p874_p3), %s681_s7, 384  }
 0x1bc   : > { %1099 = vsyncadd (!%p874_p3), %s681_s7, 4294966912  ;;  %s19_s17 = sadd.s32 1, %s1122_s17   ;;  %s1393_s12 = smov %s1106_s13 }
 0x1bd   : > { %p16_p6 = scmp.ge.s32.totalorder %s19_s17, 4   ;;  %s1394_s13 = smov %s1110_s14 }
 0x1be   : > { %s1395_s14 = smov %s1214_s26  ;;  %s1396_s15 = smov %s1118_s16 }
 0x1bf   : > { %s1397_s16 = smov %s1399_s20  ;;  %18 = sbr.rel (!%p16_p6) target bundleno = 6 (0x6), region = 87 }
 0x1c6   :  { %686 = vsyncpa [#allocation4], 1 }
 0x1c7   :  { %688 = vsyncpa [#allocation4 + $0x1], 1 }
 0x1c8   :  { %689 = vsyncpa [#allocation5], 1 }
 0x1c9   :  { %691 = vsyncpa [#allocation5 + $0x1], 1 }

</bundles_post_ra>
